<compile_context>
chip_gen: v7x
topology: tpu7x:2x2x1
jax: 0.10.0
libtpu: 0.0.40
codegen_flags: <defaults>
</compile_context>

<pallas_src>
import jax
import jax.numpy as jnp
from jax.experimental import pallas as pl
from jax.experimental.pallas import tpu as pltpu


# ----------------------------- Pallas kernel ---------------------------------
def il_head_kernel(emb_ref, wtd_ref, btd_ref, wc_ref, bc_ref, out_ref):
    """Fused head: one encoder matmul (+tanh), one classifier matmul, packed store."""
    emb = emb_ref[...]                                           # [TB, 768] bf16

    # features = tanh(emb @ [W_text | W_dist] + [b_text | b_dist])  -> [TB, 2H] f32
    feat = jnp.tanh(
        jnp.dot(emb, wtd_ref[...], preferred_element_type=jnp.float32)
        + btd_ref[...]
    )
    TB, H2 = feat.shape
    H = H2 // 2
    dist = feat[:, H:]                                           # [TB, H]

    # Single classifier MXU pass: LHS = [[text|dist], [dist|0]]  -> [2*TB, 2H]
    lhs = jnp.concatenate(
        [feat, jnp.concatenate([dist, jnp.zeros_like(dist)], axis=1)],
        axis=0,
    ).astype(wc_ref.dtype)                                       # bf16
    preds = (
        jnp.dot(lhs, wc_ref[...], preferred_element_type=jnp.float32)
        + bc_ref[...]
    )                                                            # [2*TB, C] f32
    cls_pred = preds[:TB]
    distill_pred = preds[TB:]

    # Lane-dense packed output slab: [feat | cls_pred | distill_pred | zero pad]
    packed = jnp.concatenate([feat, cls_pred, distill_pred], axis=1)
    pad = out_ref.shape[1] - packed.shape[1]
    if pad:
        packed = jnp.concatenate(
            [packed, jnp.zeros((TB, pad), packed.dtype)], axis=1
        )
    out_ref[...] = packed


def _round_up(x, m):
    return ((x + m - 1) // m) * m


def il_model_heads(xlnet_embedding, params):
    """Wrapper: fuses weights, pads batch, calls the Pallas kernel, unpacks outputs."""
    B, D = xlnet_embedding.shape
    H = params["w_text"].shape[1]
    C = params["w_cls"].shape[1]
    H2 = 2 * H
    OUT_W = _round_up(H2 + 2 * C, 128)                    # lane-dense output width

    # Fused encoder weights (in real use, fold once at init; cheap one-time concat).
    w_td = jnp.concatenate([params["w_text"], params["w_dist"]], axis=1)
    w_td = w_td.astype(jnp.bfloat16)                      # [768, 2H] bf16
    b_td = jnp.concatenate([params["b_text"], params["b_dist"]], axis=1)
    b_td = b_td.astype(jnp.float32)                       # [1, 2H]  f32
    w_c = params["w_cls"].astype(jnp.bfloat16)            # [2H, C]  bf16
    b_c = params["b_cls"].astype(jnp.float32)             # [1, C]   f32

    emb = xlnet_embedding.astype(jnp.bfloat16)            # [B, 768] bf16

    # Batch grid: tile rows, pipeline emb tiles, keep weights VMEM-resident.
    TB = 512 if B >= 512 else _round_up(B, 8)
    padded_B = _round_up(B, TB)
    if padded_B != B:
        emb = jnp.pad(emb, ((0, padded_B - B), (0, 0)))
    grid = (padded_B // TB,)

    out = pl.pallas_call(
        il_head_kernel,
        out_shape=jax.ShapeDtypeStruct((padded_B, OUT_W), jnp.float32),
        grid=grid,
        in_specs=[
            pl.BlockSpec((TB, D), lambda i: (i, 0)),      # emb tile (pipelined)
            pl.BlockSpec((D, H2), lambda i: (0, 0)),      # fused encoder weights (resident)
            pl.BlockSpec((1, H2), lambda i: (0, 0)),
            pl.BlockSpec((H2, C), lambda i: (0, 0)),      # classifier weights (resident)
            pl.BlockSpec((1, C), lambda i: (0, 0)),
        ],
        out_specs=pl.BlockSpec((TB, OUT_W), lambda i: (i, 0)),
        compiler_params=pltpu.CompilerParams(
            dimension_semantics=("parallel",)             # shard batch across TCs (v7x)
        ),
    )(emb, w_td, b_td, w_c, b_c)

    out = out[:B]
    text_features = out[:, :H]
    distill_features = out[:, H:H2]
    cls_pred = out[:, H2:H2 + C]
    distill_pred = out[:, H2 + C:H2 + 2 * C]
    return text_features, distill_features, cls_pred, distill_pred


# ------------------------- synthetic backbone (glue) -------------------------
def synthetic_xlnet_cls(input_ids, attention_mask, embed_table):
    """Deterministic stand-in for XLNetModel: gather ONLY the CLS-token embedding.
    TODO(synk): real XLNet transformer stack not implemented."""
    del attention_mask  # consumed internally by the real backbone
    return embed_table[input_ids[:, 0]]                   # [B, 768]


def il_model_forward(input_ids, attention_mask, params):
    xlnet_embedding = synthetic_xlnet_cls(input_ids, attention_mask,
                                          params["embed_table"])
    text_f, dist_f, cls_pred, distill_pred = il_model_heads(xlnet_embedding, params)
    return text_f, dist_f, cls_pred, distill_pred, xlnet_embedding


# ----------------------------------- main ------------------------------------
def init_params(key, vocab_size, hidden_size, n_class, bert_dim=768):
    ks = jax.random.split(key, 7)
    scale = 0.02
    return {
        "embed_table": scale * jax.random.normal(ks[0], (vocab_size, bert_dim), jnp.float32),
        "w_text": scale * jax.random.normal(ks[1], (bert_dim, hidden_size), jnp.float32),
        "b_text": scale * jax.random.normal(ks[2], (1, hidden_size), jnp.float32),
        "w_dist": scale * jax.random.normal(ks[3], (bert_dim, hidden_size), jnp.float32),
        "b_dist": scale * jax.random.normal(ks[4], (1, hidden_size), jnp.float32),
        "w_cls": scale * jax.random.normal(ks[5], (2 * hidden_size, n_class), jnp.float32),
        "b_cls": scale * jax.random.normal(ks[6], (1, n_class), jnp.float32),
    }


if __name__ == "__main__":
    B, S = 2, 8                 # batch, sequence length
    VOCAB = 64                  # synthetic vocab for the stand-in backbone
    HIDDEN = 32                 # module's hidden_size
    N_CLASS = 4

    key = jax.random.PRNGKey(0)
    k_par, k_ids = jax.random.split(key)

    params = init_params(k_par, VOCAB, HIDDEN, N_CLASS)
    input_ids = jax.random.randint(k_ids, (B, S), 0, VOCAB, dtype=jnp.int32)
    attention_mask = jnp.ones((B, S), dtype=jnp.int32)

    outs = jax.jit(il_model_forward)(input_ids, attention_mask, params)
    outs = jax.block_until_ready(outs)

    text_f, dist_f, cls_pred, distill_pred, xlnet_emb = outs
    assert text_f.shape == (B, HIDDEN)
    assert dist_f.shape == (B, HIDDEN)
    assert cls_pred.shape == (B, N_CLASS)
    assert distill_pred.shape == (B, N_CLASS)
    assert xlnet_emb.shape == (B, 768)

    # Pure-JAX reference of the head math with the same bf16 rounding of inputs/weights.
    emb_r = xlnet_emb.astype(jnp.bfloat16).astype(jnp.float32)
    w_t = params["w_text"].astype(jnp.bfloat16).astype(jnp.float32)
    w_d = params["w_dist"].astype(jnp.bfloat16).astype(jnp.float32)
    w_c = params["w_cls"].astype(jnp.bfloat16).astype(jnp.float32)
    ref_text = jnp.tanh(emb_r @ w_t + params["b_text"])
    ref_dist = jnp.tanh(emb_r @ w_d + params["b_dist"])
    ref_cls = jnp.concatenate([ref_text, ref_dist], axis=1) @ w_c + params["b_cls"]
    ref_dpred = ref_dist @ w_c[:HIDDEN] + params["b_cls"]

    assert jnp.allclose(text_f, ref_text, atol=2e-2, rtol=2e-2)
    assert jnp.allclose(dist_f, ref_dist, atol=2e-2, rtol=2e-2)
    assert jnp.allclose(cls_pred, ref_cls, atol=2e-2, rtol=2e-2)
    assert jnp.allclose(distill_pred, ref_dpred, atol=2e-2, rtol=2e-2)

    print("KERNEL_OK")
</pallas_src>

<mosaic_0001>
module attributes {stable_mosaic.version = 11 : i64} {
  func.func @il_head_kernel(%arg0: i32, %arg1: memref<8x768xbf16, #tpu.memory_space<vmem>>, %arg2: memref<768x64xbf16, #tpu.memory_space<vmem>>, %arg3: memref<1x64xf32, #tpu.memory_space<vmem>>, %arg4: memref<64x4xbf16, #tpu.memory_space<vmem>>, %arg5: memref<1x4xf32, #tpu.memory_space<vmem>>, %arg6: memref<8x128xf32, #tpu.memory_space<vmem>>) attributes {dimension_semantics = [#tpu.dimension_semantics<parallel>], iteration_bounds = array<i64: 1>, scalar_prefetch = 0 : i64, scratch_operands = 0 : i64, tpu.core_type = #tpu.core_type<tc>, window_params = [{transform_indices = @transform_0, window_bounds = array<i64: 8, 768>}, {pipeline_mode = #tpu.pipeline_mode<synchronous>, transform_indices = @transform_1, window_bounds = array<i64: 768, 64>}, {pipeline_mode = #tpu.pipeline_mode<synchronous>, transform_indices = @transform_2, window_bounds = array<i64: 1, 64>}, {pipeline_mode = #tpu.pipeline_mode<synchronous>, transform_indices = @transform_3, window_bounds = array<i64: 64, 4>}, {pipeline_mode = #tpu.pipeline_mode<synchronous>, transform_indices = @transform_4, window_bounds = array<i64: 1, 4>}, {transform_indices = @transform_5, window_bounds = array<i64: 8, 128>}]} {
    %c0 = arith.constant 0 : index
    %c0_0 = arith.constant 0 : index
    %0 = vector.load %arg1[%c0, %c0_0] : memref<8x768xbf16, #tpu.memory_space<vmem>>, vector<8x768xbf16>
    %c0_1 = arith.constant 0 : index
    %c0_2 = arith.constant 0 : index
    %1 = vector.load %arg2[%c0_1, %c0_2] : memref<768x64xbf16, #tpu.memory_space<vmem>>, vector<768x64xbf16>
    %cst = arith.constant dense<0.000000e+00> : vector<8x64xf32>
    %2 = tpu.matmul %0, %1, %cst {dimension_numbers = #tpu.dot_dimension_numbers<[1], [0], [0], [1], [0, 0, 1, 1], [], []>} : vector<8x768xbf16>, vector<768x64xbf16>, vector<8x64xf32> -> vector<8x64xf32>
    %c0_3 = arith.constant 0 : index
    %c0_4 = arith.constant 0 : index
    %3 = vector.load %arg3[%c0_3, %c0_4] : memref<1x64xf32, #tpu.memory_space<vmem>>, vector<1x64xf32>
    %4 = vector.broadcast %3 : vector<1x64xf32> to vector<8x64xf32>
    %5 = arith.addf %2, %4 : vector<8x64xf32>
    %6 = math.tanh %5 : vector<8x64xf32>
    %7 = vector.extract_strided_slice %6 {offsets = [0, 32], sizes = [8, 32], strides = [1, 1]} : vector<8x64xf32> to vector<8x32xf32>
    %cst_5 = arith.constant 0.000000e+00 : f32
    %8 = vector.broadcast %cst_5 : f32 to vector<8x32xf32>
    %9 = tpu.concatenate %7, %8 in 1 : vector<8x32xf32>, vector<8x32xf32> -> vector<8x64xf32>
    %10 = tpu.concatenate %6, %9 in 0 : vector<8x64xf32>, vector<8x64xf32> -> vector<16x64xf32>
    %11 = arith.truncf %10 : vector<16x64xf32> to vector<16x64xbf16>
    %c0_6 = arith.constant 0 : index
    %c0_7 = arith.constant 0 : index
    %12 = vector.load %arg4[%c0_6, %c0_7] : memref<64x4xbf16, #tpu.memory_space<vmem>>, vector<64x4xbf16>
    %cst_8 = arith.constant dense<0.000000e+00> : vector<16x4xf32>
    %13 = tpu.matmul %11, %12, %cst_8 {dimension_numbers = #tpu.dot_dimension_numbers<[1], [0], [0], [1], [0, 0, 1, 1], [], []>} : vector<16x64xbf16>, vector<64x4xbf16>, vector<16x4xf32> -> vector<16x4xf32>
    %c0_9 = arith.constant 0 : index
    %c0_10 = arith.constant 0 : index
    %14 = vector.load %arg5[%c0_9, %c0_10] : memref<1x4xf32, #tpu.memory_space<vmem>>, vector<1x4xf32>
    %15 = vector.broadcast %14 : vector<1x4xf32> to vector<16x4xf32>
    %16 = arith.addf %13, %15 : vector<16x4xf32>
    %17 = vector.extract_strided_slice %16 {offsets = [0, 0], sizes = [8, 4], strides = [1, 1]} : vector<16x4xf32> to vector<8x4xf32>
    %18 = vector.extract_strided_slice %16 {offsets = [8, 0], sizes = [8, 4], strides = [1, 1]} : vector<16x4xf32> to vector<8x4xf32>
    %19 = tpu.concatenate %6, %17, %18 in 1 : vector<8x64xf32>, vector<8x4xf32>, vector<8x4xf32> -> vector<8x72xf32>
    %cst_11 = arith.constant 0.000000e+00 : f32
    %20 = vector.broadcast %cst_11 : f32 to vector<8x56xf32>
    %21 = tpu.concatenate %19, %20 in 1 : vector<8x72xf32>, vector<8x56xf32> -> vector<8x128xf32>
    %c0_12 = arith.constant 0 : index
    %c0_13 = arith.constant 0 : index
    %22 = vector.load %arg6[%c0_12, %c0_13] : memref<8x128xf32, #tpu.memory_space<vmem>>, vector<8x128xf32>
    tpu.vector_store %arg6[%c0_12, %c0_13], %21 {strides = array<i32>} : memref<8x128xf32, #tpu.memory_space<vmem>>, vector<8x128xf32>,
    return
  }
  func.func @transform_0(%arg0: i32) -> (i32, i32) {
    %c0_i32 = arith.constant 0 : i32
    %c0_i32_0 = arith.constant 0 : i32
    return %arg0, %c0_i32 : i32, i32
  }
  func.func @transform_1(%arg0: i32) -> (i32, i32) {
    %c0_i32 = arith.constant 0 : i32
    %c0_i32_0 = arith.constant 0 : i32
    %c0_i32_1 = arith.constant 0 : i32
    return %c0_i32, %c0_i32_0 : i32, i32
  }
  func.func @transform_2(%arg0: i32) -> (i32, i32) {
    %c0_i32 = arith.constant 0 : i32
    %c0_i32_0 = arith.constant 0 : i32
    %c0_i32_1 = arith.constant 0 : i32
    return %c0_i32, %c0_i32_0 : i32, i32
  }
  func.func @transform_3(%arg0: i32) -> (i32, i32) {
    %c0_i32 = arith.constant 0 : i32
    %c0_i32_0 = arith.constant 0 : i32
    %c0_i32_1 = arith.constant 0 : i32
    return %c0_i32, %c0_i32_0 : i32, i32
  }
  func.func @transform_4(%arg0: i32) -> (i32, i32) {
    %c0_i32 = arith.constant 0 : i32
    %c0_i32_0 = arith.constant 0 : i32
    %c0_i32_1 = arith.constant 0 : i32
    return %c0_i32, %c0_i32_0 : i32, i32
  }
  func.func @transform_5(%arg0: i32) -> (i32, i32) {
    %c0_i32 = arith.constant 0 : i32
    %c0_i32_0 = arith.constant 0 : i32
    return %arg0, %c0_i32 : i32, i32
  }
}

</mosaic_0001>

<bundles_post_ra>
// kernel: il_model_forward.1
= control target key start
LH: loop header
LB: loop body
LE: loop exit
PB: predicated region body
PF: predicated region fallthrough
CT: control target
= control target key end

     0   :  { %v875_v57 = vmov 0.0   ;;  %vm876_vm0 = vmmov 0   ;;  %vm561_vm1 = vcmask 261120   ;;  %vm603_vm2 = vcmask 523264   ;;  %s879_s30 = smov 68   ;;  %s1086_s1 = inlined_call_operand.vmem [shape: bf16[768,64], index: 1, kind: input, shape index: {}]   ;;  %s1087_s0 = inlined_call_operand.vmem [shape: bf16[8,768], index: 0, kind: input, shape index: {}]   ;;  %s1088_s3 = inlined_call_operand.vmem [shape: bf16[64,4], index: 3, kind: input, shape index: {}]   ;;  %s1089_s2 = inlined_call_operand.vmem [shape: f32[1,64], index: 2, kind: input, shape index: {}]   ;;  %s1090_s4 = inlined_call_operand.vmem [shape: f32[1,4], index: 4, kind: input, shape index: {}]   ;;  %s1091_s5 = inlined_call_operand.vmem [shape: f32[8,128], index: 5, kind: output, shape index: {}]  }
   0x1   :  { %v815_v0 = vld [vmem:[%s1086_s1 + $0x40] sm:$0xff]   ;;  %v819_v4 = vld [vmem:[%s1086_s1 + $0x48] sm:$0xff]   ;;  %v823_v8 = vld [vmem:[%s1086_s1 + $0x50] sm:$0xff]   ;;  %vm657_vm3 = vcmask 556032   ;;  %vm659_vm4 = vcmask 588800  }
   0x2   :  { %v816_v1 = vld [vmem:[%s1086_s1] sm:$0xff]   ;;  %727 = vmatprep.subr.bf16.mxu0 %v815_v0  ;;  %v820_v5 = vld [vmem:[%s1086_s1 + $0x8] sm:$0xff]   ;;  %v824_v9 = vld [vmem:[%s1086_s1 + $0x10] sm:$0xff]  }
   0x3   :  { %v817_v2 = vld [vmem:[%s1086_s1 + $0xc0] sm:$0xff]   ;;  %728 = vmatpush3.bf16.msra.mxu0 %v816_v1  ;;  %v821_v6 = vld [vmem:[%s1086_s1 + $0xc8] sm:$0xff]   ;;  %v825_v10 = vld [vmem:[%s1086_s1 + $0xd0] sm:$0xff]  }
   0x4   :  { %v818_v3 = vld [vmem:[%s1086_s1 + $0x80] sm:$0xff]   ;;  %749 = vmatprep.subr.bf16.mxu1 %v817_v2  ;;  %729 = vmatprep.subr.bf16.mxu0 %v819_v4  ;;  %v822_v7 = vld [vmem:[%s1086_s1 + $0x88] sm:$0xff]   ;;  %v826_v11 = vld [vmem:[%s1086_s1 + $0x90] sm:$0xff]  }
   0x5   :  { %750 = vmatpush3.bf16.msra.mxu1 %v818_v3  ;;  %v827_v12 = vld [vmem:[%s1086_s1 + $0x58] sm:$0xff]   ;;  %v831_v16 = vld [vmem:[%s1086_s1 + $0x60] sm:$0xff]   ;;  %v835_v20 = vld [vmem:[%s1086_s1 + $0x68] sm:$0xff]  }
   0x6   :  { %751 = vmatprep.subr.bf16.mxu1 %v821_v6  ;;  %v828_v13 = vld [vmem:[%s1086_s1 + $0x18] sm:$0xff]   ;;  %v832_v17 = vld [vmem:[%s1086_s1 + $0x20] sm:$0xff]   ;;  %v836_v21 = vld [vmem:[%s1086_s1 + $0x28] sm:$0xff]  }
   0x7   :  { %730 = vmatpush3.bf16.msra.mxu0 %v820_v5  ;;  %v829_v14 = vld [vmem:[%s1086_s1 + $0xd8] sm:$0xff]   ;;  %v833_v18 = vld [vmem:[%s1086_s1 + $0xe0] sm:$0xff]   ;;  %v837_v22 = vld [vmem:[%s1086_s1 + $0xe8] sm:$0xff]  }
   0x8   :  { %731 = vmatprep.subr.bf16.mxu0 %v823_v8  ;;  %v830_v15 = vld [vmem:[%s1086_s1 + $0x98] sm:$0xff]   ;;  %v834_v19 = vld [vmem:[%s1086_s1 + $0xa0] sm:$0xff]   ;;  %v838_v23 = vld [vmem:[%s1086_s1 + $0xa8] sm:$0xff]  }
   0x9   :  { %752 = vmatpush3.bf16.msra.mxu1 %v822_v7  ;;  %v839_v24 = vld [vmem:[%s1086_s1 + $0x70] sm:$0xff]   ;;  %v843_v28 = vld [vmem:[%s1086_s1 + $0x78] sm:$0xff]   ;;  %v21_v31 = vld [vmem:[%s1087_s0] sm:$0xff] }
   0xa   :  { %753 = vmatprep.subr.bf16.mxu1 %v825_v10  ;;  %v840_v25 = vld [vmem:[%s1086_s1 + $0x30] sm:$0xff]   ;;  %v844_v29 = vld [vmem:[%s1086_s1 + $0x38] sm:$0xff]   ;;  %v667_v32 = vcombine.low %v21_v31, %v21_v31  ;;  %v668_v33 = vcombine.high %v21_v31, %v21_v31  ;;  %v849_v35 = vld [vmem:[%s1086_s1 + $0x140] sm:$0xff]  }
   0xb   :  { %732 = vmatpush3.bf16.msra.mxu0 %v824_v9  ;;  %v841_v26 = vld [vmem:[%s1086_s1 + $0xf0] sm:$0xff]   ;;  %v845_v30 = vld [vmem:[%s1086_s1 + $0xf8] sm:$0xff]   ;;  %v22_v36 = vld [vmem:[%s1087_s0 + $0x8] sm:$0xff] }
   0xc   :  { %733 = vmatprep.subr.bf16.mxu0 %v827_v12  ;;  %v842_v27 = vld [vmem:[%s1086_s1 + $0xb0] sm:$0xff]   ;;  %v848_v34 = vld [vmem:[%s1086_s1 + $0xb8] sm:$0xff]   ;;  %468 = vmatprep.mubr.bf16.mxu0 %v668_v33  ;;  %v669_v37 = vcombine.low %v22_v36, %v22_v36  ;;  %v670_v38 = vcombine.high %v22_v36, %v22_v36  ;;  %v852_v39 = vld [vmem:[%s1086_s1 + $0x100] sm:$0xff]  }
   0xd   :  { %754 = vmatpush3.bf16.msra.mxu1 %v826_v11  ;;  %v853_v40 = vld [vmem:[%s1086_s1 + $0x148] sm:$0xff]   ;;  %v855_v42 = vld [vmem:[%s1086_s1 + $0x150] sm:$0xff]   ;;  %v857_v44 = vld [vmem:[%s1086_s1 + $0x158] sm:$0xff]  }
   0xe   :  { %755 = vmatprep.subr.bf16.mxu1 %v829_v14  ;;  %508 = vmatprep.mubr.bf16.mxu1 %v670_v38  ;;  %v854_v41 = vld [vmem:[%s1086_s1 + $0x108] sm:$0xff]   ;;  %v856_v43 = vld [vmem:[%s1086_s1 + $0x110] sm:$0xff]   ;;  %v858_v45 = vld [vmem:[%s1086_s1 + $0x118] sm:$0xff]  }
   0xf   :  { %734 = vmatpush3.bf16.msra.mxu0 %v828_v13  ;;  %v859_v46 = vld [vmem:[%s1086_s1 + $0x160] sm:$0xff]   ;;  %v23_v48 = vld [vmem:[%s1087_s0 + $0x10] sm:$0xff]  ;;  %v861_v49 = vld [vmem:[%s1086_s1 + $0x168] sm:$0xff]  }
  0x10   :  { %735 = vmatprep.subr.bf16.mxu0 %v831_v16  ;;  %v860_v47 = vld [vmem:[%s1086_s1 + $0x120] sm:$0xff]   ;;  %v672_v50 = vcombine.high %v23_v48, %v23_v48  ;;  %v862_v51 = vld [vmem:[%s1086_s1 + $0x128] sm:$0xff]   ;;  %v863_v52 = vld [vmem:[%s1086_s1 + $0x170] sm:$0xff]   ;;  %v671_v56 = vcombine.low %v23_v48, %v23_v48 }
  0x11   :  { %756 = vmatpush3.bf16.msra.mxu1 %v830_v15  ;;  %v864_v53 = vld [vmem:[%s1086_s1 + $0x130] sm:$0xff]   ;;  %v865_v54 = vld [vmem:[%s1086_s1 + $0x178] sm:$0xff]   ;;  %v869_v58 = vld [vmem:[%s1088_s3] sm:$0xff]  }
  0x12   :  { %757 = vmatprep.subr.bf16.mxu1 %v833_v18  ;;  %v866_v55 = vld [vmem:[%s1086_s1 + $0x138] sm:$0xff]   ;;  %v870_v59 = vld [vmem:[%s1088_s3 + $0x8] sm:$0xff]   ;;  %v871_v60 = vld [vmem:[%s1088_s3 + $0x10] sm:$0xff]  }
  0x13   :  { %736 = vmatpush3.bf16.msra.mxu0 %v832_v17  ;;  %v666_v62 = vld [vmem:[%s1089_s2] ss:$0 sm:$0xff]  ;;  %v872_v14 = vld [vmem:[%s1088_s3 + $0x18] sm:$0xff]   ;;  %s877_s2 = smov 96   ;;  %s878_s3 = smov 64  }
  0x14   :  { %737 = vmatprep.subr.bf16.mxu0 %v835_v20 }
  0x15   :  { %758 = vmatpush3.bf16.msra.mxu1 %v834_v19 }
  0x16   :  { %759 = vmatprep.subr.bf16.mxu1 %v837_v22 }
  0x17   :  { %738 = vmatpush3.bf16.msra.mxu0 %v836_v21  ;;  %v721_v21 = vld [vmem:[%s1090_s4] ss:$0 sm:$0xff] }
  0x18   :  { %739 = vmatprep.subr.bf16.mxu0 %v839_v24 }
  0x19   :  { %760 = vmatpush3.bf16.msra.mxu1 %v838_v23 }
  0x1a   :  { %761 = vmatprep.subr.bf16.mxu1 %v841_v26 }
  0x1b   :  { %740 = vmatpush3.bf16.msra.mxu0 %v840_v25 }
  0x1c   :  { %741 = vmatprep.subr.bf16.mxu0 %v843_v28 }
  0x1d   :  { %762 = vmatpush3.bf16.msra.mxu1 %v842_v27 }
  0x1e   :  { %763 = vmatprep.subr.bf16.mxu1 %v845_v30 }
  0x1f   :  { %742 = vmatpush3.bf16.msra.mxu0 %v844_v29 }
  0x20   :  { %771 = vmatprep.subr.bf16.mxu0 %v849_v35 }
  0x21   :  { %764 = vmatpush3.bf16.msra.mxu1 %v848_v34 }
  0x22   :  { %469 = vmatmul.mubr.bf16.vlgmr.msra.gmra.mrb[0].mxu0 %v667_v32  ;;  %798 = vmatprep.subr.bf16.mxu1 %v875_v57 }
  0x23   :  { %772 = vmatpush3.bf16.msra.mxu0 %v852_v39  ;;  %548 = vmatprep.mubr.bf16.mxu0 %v672_v50 }
  0x24   :  { %509 = vmatmul.mubr.bf16.vlgmr.msra.gmra.mrb[0].mxu1 %v669_v37  ;;  %773 = vmatprep.subr.bf16.mxu0 %v853_v40 }
  0x25   :  { %799 = vmatpush3.bf16.msra.mxu1 %v869_v58  ;;  %806 = vmatprep.mubr.msk.bf16.mxu1 %vm876_vm0, %v875_v57 }
  0x26   :  { %800 = vmatprep.subr.bf16.mxu1 %v875_v57 }
  0x27   :  { %774 = vmatpush3.bf16.msra.mxu0 %v854_v41 }
  0x28   :  { %775 = vmatprep.subr.bf16.mxu0 %v855_v42 }
  0x29   :  { %801 = vmatpush3.bf16.msra.mxu1 %v870_v59 }
  0x2a   :  { %802 = vmatprep.subr.bf16.mxu1 %v875_v57 }
  0x2b   :  { %776 = vmatpush3.bf16.msra.mxu0 %v856_v43 }
  0x2c   :  { %777 = vmatprep.subr.bf16.mxu0 %v857_v44 }
  0x2d   :  { %803 = vmatpush3.bf16.msra.mxu1 %v871_v60 }
  0x2e   :  { %804 = vmatprep.subr.bf16.mxu1 %v875_v57 }
  0x2f   :  { %778 = vmatpush3.bf16.msra.mxu0 %v858_v45 }
  0x30   :  { %779 = vmatprep.subr.bf16.mxu0 %v859_v46 }
  0x31   :  { %805 = vmatpush3.bf16.msra.mxu1 %v872_v14 }
  0x33   :  { %780 = vmatpush3.bf16.msra.mxu0 %v860_v47 }
  0x34   :  { %781 = vmatprep.subr.bf16.mxu0 %v861_v49 }
  0x37   :  { %782 = vmatpush3.bf16.msra.mxu0 %v862_v51 }
  0x38   :  { %783 = vmatprep.subr.bf16.mxu0 %v863_v52 }
  0x3b   :  { %784 = vmatpush3.bf16.msra.mxu0 %v864_v53 }
  0x3c   :  { %785 = vmatprep.subr.bf16.mxu0 %v865_v54 }
  0x3f   :  { %786 = vmatpush3.bf16.msra.mxu0 %v866_v55 }
  0x42   :  { %549 = vmatmul.mubr.bf16.vlgmr.msra.gmra.mrb[4].mxu0 %v671_v56 }
  0xf5   :  { %v743_v61 = vpop.f32.mrb[0].mxu0 }
  0xf6   :  { %v744_v63 = vpop.f32.mrb[1].mxu0 }
  0xf7   :  { %v745_v0 = vadd.f32 %v744_v63, %v743_v61  ;;  %v746_v1 = vpop.f32.mrb[2].mxu0  ;;  %v765_v2 = vpop.f32.mrb[0].mxu1 }
  0xf8   :  { %v747_v3 = vpop.f32.mrb[3].mxu0  ;;  %v766_v4 = vpop.f32.mrb[1].mxu1 }
  0xf9   :  { %v471_v5 = vadd.f32 %v745_v0, %v666_v62  ;;  %v767_v6 = vadd.f32 %v766_v4, %v765_v2  ;;  %v768_v7 = vpop.f32.mrb[2].mxu1 }
  0xfa   :  { %v769_v8 = vpop.f32.mrb[3].mxu1 }
  0xfb   :  { %v511_v9 = vadd.f32 %v767_v6, %v471_v5 }
 0x115   :  { %v787_v10 = vpop.f32.mrb[4].mxu0 }
 0x116   :  { %v788_v11 = vpop.f32.mrb[5].mxu0 }
 0x117   :  { %v789_v12 = vadd.f32 %v788_v11, %v787_v10  ;;  %v790_v13 = vpop.f32.mrb[6].mxu0 }
 0x118   :  { %v791_v15 = vpop.f32.mrb[7].mxu0 }
 0x119   :  { %v551_v16 = vadd.f32 %v789_v12, %v511_v9 }
 0x11b   :  { %873 = vtanh.f32 %v551_v16 }
 0x125   :  { %v874_v17 = vpop.eup %873 }
 0x126   :  { %558 = vrot.lane.b32.xlu0 %v874_v17, %s877_s2 }
 0x198   :  { %v559_v18 = vpop.permute.xlu0 %558 }
 0x199   :  { %v562_v19 = vsel %vm561_vm1, %v559_v18, 0.0 }
 0x19a   :  { %v563_v20 = vpack.c.bf16 %v562_v19, %v874_v17 }
 0x19c   :  { %807 = vmatmul.mubr.msk.bf16.vlgmr.msra.gmra.mrb[4].mxu1 %vm603_vm2, %v563_v20 }
 0x26f   :  { %v641_v22 = vpop.f32.mrb[4].mxu1 }
 0x270   :  { %v642_v23 = vadd.f32 %v721_v21, %v641_v22  ;;  %v808_v24 = vpop.f32.mrb[5].mxu1 }
 0x271   :  { %v644_v25 = vpop.f32.mrb[6].mxu1 }
 0x272   :  { %v645_v26 = vadd.f32 %v721_v21, %v644_v25  ;;  %649 = vrot.lane.b32.xlu0 %v642_v23, %s878_s3  ;;  %v809_v27 = vpop.f32.mrb[7].mxu1 }
 0x274   :  { %653 = vrot.lane.b32.xlu1 %v645_v26, %s879_s30 }
 0x2e4   :  { %v650_v28 = vpop.permute.xlu0 %649 }
 0x2e5   :  { %v656_v29 = vsel %vm603_vm2, %v874_v17, %v650_v28 }
 0x2e6   :  { %v654_v30 = vpop.permute.xlu1 %653 }
 0x2e7   :  { %v658_v31 = vsel %vm657_vm3, %v656_v29, %v654_v30 }
 0x2e8   :  { %v660_v32 = vsel %vm659_vm4, %v658_v31, 0.0 }
 0x2e9   :  { %661 = vst [vmem:[%s1091_s5] sm:$0xff] %v660_v32 }

</bundles_post_ra>
